<compile_context>
chip_gen: v6e
topology: v6e:2x2x1
jax: 0.10.0
libtpu: 0.0.40
codegen_flags: <defaults>
</compile_context>

<pallas_src>
import functools

import jax
import jax.numpy as jnp
from jax.experimental import pallas as pl
from jax.experimental.pallas import tpu as pltpu

_LANE = 128     # lane width / MXU-friendly column multiple
_SUBLANE = 8    # sublane multiple for the row axis


def _round_up(x, m):
    return ((x + m - 1) // m) * m


def _pad2d(a, rows, cols):
    r, c = a.shape
    return jnp.pad(a, ((0, rows - r), (0, cols - c)))


# ---------------------------------------------------------------------------
# Fused Pallas kernel: all FC layers + merged mean/log_var head in one body.
# refs = (x_ref, w0, b0, w1, b1, ..., w_heads, b_heads, out_ref)
# ---------------------------------------------------------------------------
def _encoder_fused_kernel(*refs, num_fc):
    x_ref = refs[0]
    out_ref = refs[-1]

    h = x_ref[...]                                    # bf16 row tile
    for i in range(num_fc):
        w = refs[1 + 2 * i][...]                      # bf16 weights -> MXU
        b = refs[2 + 2 * i][...]                      # (1, N_p) f32 bias
        acc = jnp.dot(h, w, preferred_element_type=jnp.float32)
        # Bias-add + ReLU on the f32 accumulator (required on v5e: no bf16
        # VPU), then narrow back to bf16 for the next MXU pass.
        h = jnp.maximum(acc + b, 0.0).astype(w.dtype)

    w_heads = refs[1 + 2 * num_fc][...]               # [F_last_p, 2Z] bf16
    b_heads = refs[2 + 2 * num_fc][...]               # (1, 2Z) f32
    out_ref[...] = (
        jnp.dot(h, w_heads, preferred_element_type=jnp.float32) + b_heads
    ).astype(out_ref.dtype)


# ---------------------------------------------------------------------------
# Parameters: PyTorch-equivalent (unpadded) params + one-time padded prep.
# ---------------------------------------------------------------------------
def init_encoder_params(key, layer_sizes, latent_dim):
    """Deterministic synthetic parameters (not a checkpoint load). Weights are
    stored [F_in, F_out] so y = x @ W + b matches PyTorch's x @ W.T + b."""
    params = {"fc": []}
    for in_size, out_size in zip(layer_sizes[:-1], layer_sizes[1:]):
        key, kw, kb = jax.random.split(key, 3)
        w = jax.random.normal(kw, (in_size, out_size), jnp.float32) * (
            1.0 / jnp.sqrt(in_size))
        b = jax.random.normal(kb, (out_size,), jnp.float32) * 0.01
        params["fc"].append((w, b))
    key, kwm, kbm, kwv, kbv = jax.random.split(key, 5)
    f_last = layer_sizes[-1]
    params["mean"] = (
        jax.random.normal(kwm, (f_last, latent_dim), jnp.float32)
        * (1.0 / jnp.sqrt(f_last)),
        jax.random.normal(kbm, (latent_dim,), jnp.float32) * 0.01,
    )
    params["log_var"] = (
        jax.random.normal(kwv, (f_last, latent_dim), jnp.float32)
        * (1.0 / jnp.sqrt(f_last)),
        jax.random.normal(kbv, (latent_dim,), jnp.float32) * 0.01,
    )
    return params


def prepare_padded_params(params, layer_sizes, latent_dim,
                          compute_dtype=jnp.bfloat16):
    """One-time layout prep:
       * first FC layer keeps K = f_in (unpadded; MXU zero-fills K internally),
         only its N is padded to 128,
       * subsequent layers pad K to the previous layer's padded N and pad N,
       * mean/log_var heads are merged into one [F_last_p, 2Z] matrix with
         UNPADDED N (trimmed output writeback),
       * weights are cast to bf16 once; biases stay f32 as (1, F) rows."""
    fc_padded = []
    cur = layer_sizes[0]                       # activation width for next GEMM
    for w, b in params["fc"]:
        _, n_out = w.shape
        n_p = _round_up(n_out, _LANE)
        fc_padded.append((
            _pad2d(w, cur, n_p).astype(compute_dtype),
            _pad2d(b.reshape(1, -1), 1, n_p).astype(jnp.float32),
        ))
        cur = n_p

    wm, bm = params["mean"]
    wv, bv = params["log_var"]
    w_heads = jnp.concatenate([wm, wv], axis=1)            # [F_last, 2Z]
    b_heads = jnp.concatenate([bm, bv], axis=0).reshape(1, -1)
    heads_padded = (
        _pad2d(w_heads, cur, w_heads.shape[1]).astype(compute_dtype),
        b_heads.astype(jnp.float32),
    )

    return {
        "fc": fc_padded,
        "heads": heads_padded,
        "f_in": layer_sizes[0],
        "out_cols": 2 * latent_dim,
        "compute_dtype": compute_dtype,
    }


# ---------------------------------------------------------------------------
# Generation-aware tile_rows / vmem_limit selection.
# ---------------------------------------------------------------------------
def _select_tile_rows_and_vmem(n, f_in, widths, resident_bytes, in_itemsize):
    try:
        vmem_cap = int(pltpu.get_tpu_info().vmem_capacity_bytes)  # per-TC
    except Exception:
        vmem_cap = 64 << 20          # conservative (v7x per-TensorCore)

    # Budget: 70% of per-TC VMEM minus resident weights/biases (worst case
    # double-buffered, in case single-buffering is not honored).
    budget = int(0.7 * vmem_cap) - 2 * resident_bytes
    per_row = (2 * f_in * in_itemsize          # double-buffered x tile (bf16)
               + 2 * widths[-1] * 4            # double-buffered f32 out tile
               + 3 * max(widths) * 4)          # f32 intermediate-activation headroom
    tile_rows = budget // max(per_row, 1)
    tile_rows = max(_SUBLANE, min(1024, tile_rows))
    tile_rows = min(tile_rows, _round_up(n, _SUBLANE))
    tile_rows = max(_SUBLANE, (tile_rows // _SUBLANE) * _SUBLANE)

    need = 2 * resident_bytes + tile_rows * per_row + (4 << 20)
    vmem_limit = int(min(int(0.9 * vmem_cap), max(need, 32 << 20)))
    return int(tile_rows), vmem_limit


# ---------------------------------------------------------------------------
# Forward pass: single fused pallas_call, grid over batch rows.
# ---------------------------------------------------------------------------
def encoder_forward(padded, x, latent_dim, *, tile_rows=None):
    # TODO(synk): conditional path (batch one-hot concat via CondLayers with
    # n_classes > 0), dropout and batch/layer-norm flags are not implemented;
    # this is the unconditional eval forward (batch=None, use_dr=use_bn=use_ln=False).
    n, f_in = x.shape
    assert f_in == padded["f_in"], "input width must match layer_sizes[0]"
    compute_dtype = padded["compute_dtype"]
    # Ideally the caller already stores x in bf16 (no-op cast here); if x is
    # f32 this is one extra streaming cast paid once.
    x = x.astype(compute_dtype)

    num_fc = len(padded["fc"])
    out_cols = padded["out_cols"]
    weights = [t for pair in padded["fc"] for t in pair] + list(padded["heads"])
    resident_bytes = sum(int(t.size) * t.dtype.itemsize for t in weights)
    widths = [f_in] + [w.shape[1] for w, _ in padded["fc"]] + [out_cols]

    auto_rows, vmem_limit = _select_tile_rows_and_vmem(
        n, f_in, widths, resident_bytes, jnp.dtype(compute_dtype).itemsize)
    if tile_rows is None:
        tile_rows = auto_rows
    grid = (pl.cdiv(n, tile_rows),)       # partial last tile, no row padding

    def build(single_buffer_weights):
        def const_spec(shape):
            # Weights/biases are grid-invariant -> no benefit from the default
            # double-buffering; single-buffer them to halve their VMEM.
            if single_buffer_weights:
                return pl.BlockSpec(shape, lambda i: (0, 0),
                                    pipeline_mode=pl.Buffered(1))
            return pl.BlockSpec(shape, lambda i: (0, 0))

        in_specs = [pl.BlockSpec((tile_rows, f_in), lambda i: (i, 0))]
        for w, b in padded["fc"]:
            in_specs += [const_spec(w.shape), const_spec(b.shape)]
        w_heads, b_heads = padded["heads"]
        in_specs += [const_spec(w_heads.shape), const_spec(b_heads.shape)]

        return pl.pallas_call(
            functools.partial(_encoder_fused_kernel, num_fc=num_fc),
            out_shape=jax.ShapeDtypeStruct((n, out_cols), jnp.float32),
            grid=grid,
            in_specs=in_specs,
            out_specs=pl.BlockSpec((tile_rows, out_cols), lambda i: (i, 0)),
            compiler_params=pltpu.CompilerParams(
                dimension_semantics=("parallel",),
                vmem_limit_bytes=vmem_limit),
        )

    operands = [x] + weights
    try:
        out = build(True)(*operands)
    except Exception:
        # Fallback if this JAX build rejects pipeline_mode=pl.Buffered(1).
        out = build(False)(*operands)

    means = out[:, :latent_dim]
    log_vars = out[:, latent_dim:]
    return means, log_vars


# ---------------------------------------------------------------------------
# References.
# ---------------------------------------------------------------------------
def encoder_forward_ref(params, x, compute_dtype=jnp.bfloat16):
    """Pure-JAX reference mirroring the kernel's bf16-in / f32-accumulate math."""
    h = x.astype(compute_dtype)
    for w, b in params["fc"]:
        acc = jnp.dot(h, w.astype(compute_dtype),
                      preferred_element_type=jnp.float32)
        h = jnp.maximum(acc + b, 0.0).astype(compute_dtype)
    wm, bm = params["mean"]
    wv, bv = params["log_var"]
    means = jnp.dot(h, wm.astype(compute_dtype),
                    preferred_element_type=jnp.float32) + bm
    log_vars = jnp.dot(h, wv.astype(compute_dtype),
                       preferred_element_type=jnp.float32) + bv
    return means, log_vars


def encoder_forward_ref_f32(params, x):
    """Full-precision reference of the PyTorch module's math (loose check)."""
    h = x
    for w, b in params["fc"]:
        h = jnp.maximum(h @ w + b, 0.0)
    means = h @ params["mean"][0] + params["mean"][1]
    log_vars = h @ params["log_var"][0] + params["log_var"][1]
    return means, log_vars


if __name__ == "__main__":
    layer_sizes = [32, 64, 32]   # input dim 32, two FC layers (32->64, 64->32)
    latent_dim = 16
    n_batch = 8

    key = jax.random.PRNGKey(0)
    key, kx = jax.random.split(key)
    x = jax.random.normal(kx, (n_batch, layer_sizes[0]), jnp.float32)

    params = init_encoder_params(key, layer_sizes, latent_dim)
    padded = prepare_padded_params(params, layer_sizes, latent_dim)

    means, log_vars = encoder_forward(padded, x, latent_dim)
    means, log_vars = jax.block_until_ready((means, log_vars))

    assert means.shape == (n_batch, latent_dim)
    assert log_vars.shape == (n_batch, latent_dim)
    assert means.dtype == jnp.float32 and log_vars.dtype == jnp.float32

    # Tight check vs. a reference that mirrors the kernel's bf16/f32 math.
    ref_m, ref_lv = encoder_forward_ref(params, x)
    assert jnp.allclose(means, ref_m, atol=5e-3, rtol=5e-3), \
        float(jnp.max(jnp.abs(means - ref_m)))
    assert jnp.allclose(log_vars, ref_lv, atol=5e-3, rtol=5e-3), \
        float(jnp.max(jnp.abs(log_vars - ref_lv)))

    # Loose sanity check vs. the full-f32 module semantics.
    ref_m32, ref_lv32 = encoder_forward_ref_f32(params, x)
    assert jnp.allclose(means, ref_m32, atol=1e-1, rtol=1e-1)
    assert jnp.allclose(log_vars, ref_lv32, atol=1e-1, rtol=1e-1)

    print("KERNEL_OK")
</pallas_src>

<mosaic_0001>
module attributes {stable_mosaic.version = 11 : i64} {
  func.func @_encoder_fused_kernel(%arg0: i32, %arg1: memref<8x32xbf16, #tpu.memory_space<vmem>>, %arg2: memref<32x128xbf16, #tpu.memory_space<vmem>>, %arg3: memref<1x128xf32, #tpu.memory_space<vmem>>, %arg4: memref<128x128xbf16, #tpu.memory_space<vmem>>, %arg5: memref<1x128xf32, #tpu.memory_space<vmem>>, %arg6: memref<128x32xbf16, #tpu.memory_space<vmem>>, %arg7: memref<1x32xf32, #tpu.memory_space<vmem>>, %arg8: memref<8x32xf32, #tpu.memory_space<vmem>>) attributes {dimension_semantics = [#tpu.dimension_semantics<parallel>], iteration_bounds = array<i64: 1>, scalar_prefetch = 0 : i64, scratch_operands = 0 : i64, tpu.core_type = #tpu.core_type<tc>, window_params = [{transform_indices = @transform_0, window_bounds = array<i64: 8, 32>}, {pipeline_mode = #tpu.pipeline_mode<synchronous>, transform_indices = @transform_1, window_bounds = array<i64: 32, 128>}, {pipeline_mode = #tpu.pipeline_mode<synchronous>, transform_indices = @transform_2, window_bounds = array<i64: 1, 128>}, {pipeline_mode = #tpu.pipeline_mode<synchronous>, transform_indices = @transform_3, window_bounds = array<i64: 128, 128>}, {pipeline_mode = #tpu.pipeline_mode<synchronous>, transform_indices = @transform_4, window_bounds = array<i64: 1, 128>}, {pipeline_mode = #tpu.pipeline_mode<synchronous>, transform_indices = @transform_5, window_bounds = array<i64: 128, 32>}, {pipeline_mode = #tpu.pipeline_mode<synchronous>, transform_indices = @transform_6, window_bounds = array<i64: 1, 32>}, {transform_indices = @transform_7, window_bounds = array<i64: 8, 32>}]} {
    %c0 = arith.constant 0 : index
    %c0_0 = arith.constant 0 : index
    %0 = vector.load %arg1[%c0, %c0_0] : memref<8x32xbf16, #tpu.memory_space<vmem>>, vector<8x32xbf16>
    %c0_1 = arith.constant 0 : index
    %c0_2 = arith.constant 0 : index
    %1 = vector.load %arg2[%c0_1, %c0_2] : memref<32x128xbf16, #tpu.memory_space<vmem>>, vector<32x128xbf16>
    %c0_3 = arith.constant 0 : index
    %c0_4 = arith.constant 0 : index
    %2 = vector.load %arg3[%c0_3, %c0_4] : memref<1x128xf32, #tpu.memory_space<vmem>>, vector<1x128xf32>
    %cst = arith.constant dense<0.000000e+00> : vector<8x128xf32>
    %3 = tpu.matmul %0, %1, %cst {dimension_numbers = #tpu.dot_dimension_numbers<[1], [0], [0], [1], [0, 0, 1, 1], [], []>} : vector<8x32xbf16>, vector<32x128xbf16>, vector<8x128xf32> -> vector<8x128xf32>
    %4 = vector.broadcast %2 : vector<1x128xf32> to vector<8x128xf32>
    %5 = arith.addf %3, %4 : vector<8x128xf32>
    %cst_5 = arith.constant 0.000000e+00 : f32
    %6 = vector.broadcast %cst_5 : f32 to vector<8x128xf32>
    %7 = arith.maximumf %5, %6 : vector<8x128xf32>
    %8 = arith.truncf %7 : vector<8x128xf32> to vector<8x128xbf16>
    %c0_6 = arith.constant 0 : index
    %c0_7 = arith.constant 0 : index
    %9 = vector.load %arg4[%c0_6, %c0_7] : memref<128x128xbf16, #tpu.memory_space<vmem>>, vector<128x128xbf16>
    %c0_8 = arith.constant 0 : index
    %c0_9 = arith.constant 0 : index
    %10 = vector.load %arg5[%c0_8, %c0_9] : memref<1x128xf32, #tpu.memory_space<vmem>>, vector<1x128xf32>
    %cst_10 = arith.constant dense<0.000000e+00> : vector<8x128xf32>
    %11 = tpu.matmul %8, %9, %cst_10 {dimension_numbers = #tpu.dot_dimension_numbers<[1], [0], [0], [1], [0, 0, 1, 1], [], []>} : vector<8x128xbf16>, vector<128x128xbf16>, vector<8x128xf32> -> vector<8x128xf32>
    %12 = vector.broadcast %10 : vector<1x128xf32> to vector<8x128xf32>
    %13 = arith.addf %11, %12 : vector<8x128xf32>
    %cst_11 = arith.constant 0.000000e+00 : f32
    %14 = vector.broadcast %cst_11 : f32 to vector<8x128xf32>
    %15 = arith.maximumf %13, %14 : vector<8x128xf32>
    %16 = arith.truncf %15 : vector<8x128xf32> to vector<8x128xbf16>
    %c0_12 = arith.constant 0 : index
    %c0_13 = arith.constant 0 : index
    %17 = vector.load %arg6[%c0_12, %c0_13] : memref<128x32xbf16, #tpu.memory_space<vmem>>, vector<128x32xbf16>
    %c0_14 = arith.constant 0 : index
    %c0_15 = arith.constant 0 : index
    %18 = vector.load %arg7[%c0_14, %c0_15] : memref<1x32xf32, #tpu.memory_space<vmem>>, vector<1x32xf32>
    %cst_16 = arith.constant dense<0.000000e+00> : vector<8x32xf32>
    %19 = tpu.matmul %16, %17, %cst_16 {dimension_numbers = #tpu.dot_dimension_numbers<[1], [0], [0], [1], [0, 0, 1, 1], [], []>} : vector<8x128xbf16>, vector<128x32xbf16>, vector<8x32xf32> -> vector<8x32xf32>
    %20 = vector.broadcast %18 : vector<1x32xf32> to vector<8x32xf32>
    %21 = arith.addf %19, %20 : vector<8x32xf32>
    %c0_17 = arith.constant 0 : index
    %c0_18 = arith.constant 0 : index
    %22 = vector.load %arg8[%c0_17, %c0_18] : memref<8x32xf32, #tpu.memory_space<vmem>>, vector<8x32xf32>
    tpu.vector_store %arg8[%c0_17, %c0_18], %21 {strides = array<i32>} : memref<8x32xf32, #tpu.memory_space<vmem>>, vector<8x32xf32>,
    return
  }
  func.func @transform_0(%arg0: i32) -> (i32, i32) {
    %c0_i32 = arith.constant 0 : i32
    %c0_i32_0 = arith.constant 0 : i32
    return %arg0, %c0_i32 : i32, i32
  }
  func.func @transform_1(%arg0: i32) -> (i32, i32) {
    %c0_i32 = arith.constant 0 : i32
    %c0_i32_0 = arith.constant 0 : i32
    %c0_i32_1 = arith.constant 0 : i32
    return %c0_i32, %c0_i32_0 : i32, i32
  }
  func.func @transform_2(%arg0: i32) -> (i32, i32) {
    %c0_i32 = arith.constant 0 : i32
    %c0_i32_0 = arith.constant 0 : i32
    %c0_i32_1 = arith.constant 0 : i32
    return %c0_i32, %c0_i32_0 : i32, i32
  }
  func.func @transform_3(%arg0: i32) -> (i32, i32) {
    %c0_i32 = arith.constant 0 : i32
    %c0_i32_0 = arith.constant 0 : i32
    %c0_i32_1 = arith.constant 0 : i32
    return %c0_i32, %c0_i32_0 : i32, i32
  }
  func.func @transform_4(%arg0: i32) -> (i32, i32) {
    %c0_i32 = arith.constant 0 : i32
    %c0_i32_0 = arith.constant 0 : i32
    %c0_i32_1 = arith.constant 0 : i32
    return %c0_i32, %c0_i32_0 : i32, i32
  }
  func.func @transform_5(%arg0: i32) -> (i32, i32) {
    %c0_i32 = arith.constant 0 : i32
    %c0_i32_0 = arith.constant 0 : i32
    %c0_i32_1 = arith.constant 0 : i32
    return %c0_i32, %c0_i32_0 : i32, i32
  }
  func.func @transform_6(%arg0: i32) -> (i32, i32) {
    %c0_i32 = arith.constant 0 : i32
    %c0_i32_0 = arith.constant 0 : i32
    %c0_i32_1 = arith.constant 0 : i32
    return %c0_i32, %c0_i32_0 : i32, i32
  }
  func.func @transform_7(%arg0: i32) -> (i32, i32) {
    %c0_i32 = arith.constant 0 : i32
    %c0_i32_0 = arith.constant 0 : i32
    return %arg0, %c0_i32 : i32, i32
  }
}

module attributes {stable_mosaic.version = 11 : i64} {
  func.func @_encoder_fused_kernel(%arg0: i32, %arg1: memref<8x32xbf16, #tpu.memory_space<vmem>>, %arg2: memref<32x128xbf16, #tpu.memory_space<vmem>>, %arg3: memref<1x128xf32, #tpu.memory_space<vmem>>, %arg4: memref<128x128xbf16, #tpu.memory_space<vmem>>, %arg5: memref<1x128xf32, #tpu.memory_space<vmem>>, %arg6: memref<128x32xbf16, #tpu.memory_space<vmem>>, %arg7: memref<1x32xf32, #tpu.memory_space<vmem>>, %arg8: memref<8x32xf32, #tpu.memory_space<vmem>>) attributes {dimension_semantics = [#tpu.dimension_semantics<parallel>], iteration_bounds = array<i64: 1>, scalar_prefetch = 0 : i64, scratch_operands = 0 : i64, tpu.core_type = #tpu.core_type<tc>, window_params = [{transform_indices = @transform_0, window_bounds = array<i64: 8, 32>}, {pipeline_mode = #tpu.pipeline_mode<synchronous>, transform_indices = @transform_1, window_bounds = array<i64: 32, 128>}, {pipeline_mode = #tpu.pipeline_mode<synchronous>, transform_indices = @transform_2, window_bounds = array<i64: 1, 128>}, {pipeline_mode = #tpu.pipeline_mode<synchronous>, transform_indices = @transform_3, window_bounds = array<i64: 128, 128>}, {pipeline_mode = #tpu.pipeline_mode<synchronous>, transform_indices = @transform_4, window_bounds = array<i64: 1, 128>}, {pipeline_mode = #tpu.pipeline_mode<synchronous>, transform_indices = @transform_5, window_bounds = array<i64: 128, 32>}, {pipeline_mode = #tpu.pipeline_mode<synchronous>, transform_indices = @transform_6, window_bounds = array<i64: 1, 32>}, {transform_indices = @transform_7, window_bounds = array<i64: 8, 32>}]} {
    %c0 = arith.constant 0 : index
    %c0_0 = arith.constant 0 : index
    %0 = vector.load %arg1[%c0, %c0_0] : memref<8x32xbf16, #tpu.memory_space<vmem>>, vector<8x32xbf16>
    %c0_1 = arith.constant 0 : index
    %c0_2 = arith.constant 0 : index
    %1 = vector.load %arg2[%c0_1, %c0_2] : memref<32x128xbf16, #tpu.memory_space<vmem>>, vector<32x128xbf16>
    %c0_3 = arith.constant 0 : index
    %c0_4 = arith.constant 0 : index
    %2 = vector.load %arg3[%c0_3, %c0_4] : memref<1x128xf32, #tpu.memory_space<vmem>>, vector<1x128xf32>
    %cst = arith.constant dense<0.000000e+00> : vector<8x128xf32>
    %3 = tpu.matmul %0, %1, %cst {dimension_numbers = #tpu.dot_dimension_numbers<[1], [0], [0], [1], [0, 0, 1, 1], [], []>} : vector<8x32xbf16>, vector<32x128xbf16>, vector<8x128xf32> -> vector<8x128xf32>
    %4 = vector.broadcast %2 : vector<1x128xf32> to vector<8x128xf32>
    %5 = arith.addf %3, %4 : vector<8x128xf32>
    %cst_5 = arith.constant 0.000000e+00 : f32
    %6 = vector.broadcast %cst_5 : f32 to vector<8x128xf32>
    %7 = arith.maximumf %5, %6 : vector<8x128xf32>
    %8 = arith.truncf %7 : vector<8x128xf32> to vector<8x128xbf16>
    %c0_6 = arith.constant 0 : index
    %c0_7 = arith.constant 0 : index
    %9 = vector.load %arg4[%c0_6, %c0_7] : memref<128x128xbf16, #tpu.memory_space<vmem>>, vector<128x128xbf16>
    %c0_8 = arith.constant 0 : index
    %c0_9 = arith.constant 0 : index
    %10 = vector.load %arg5[%c0_8, %c0_9] : memref<1x128xf32, #tpu.memory_space<vmem>>, vector<1x128xf32>
    %cst_10 = arith.constant dense<0.000000e+00> : vector<8x128xf32>
    %11 = tpu.matmul %8, %9, %cst_10 {dimension_numbers = #tpu.dot_dimension_numbers<[1], [0], [0], [1], [0, 0, 1, 1], [], []>} : vector<8x128xbf16>, vector<128x128xbf16>, vector<8x128xf32> -> vector<8x128xf32>
    %12 = vector.broadcast %10 : vector<1x128xf32> to vector<8x128xf32>
    %13 = arith.addf %11, %12 : vector<8x128xf32>
    %cst_11 = arith.constant 0.000000e+00 : f32
    %14 = vector.broadcast %cst_11 : f32 to vector<8x128xf32>
    %15 = arith.maximumf %13, %14 : vector<8x128xf32>
    %16 = arith.truncf %15 : vector<8x128xf32> to vector<8x128xbf16>
    %c0_12 = arith.constant 0 : index
    %c0_13 = arith.constant 0 : index
    %17 = vector.load %arg6[%c0_12, %c0_13] : memref<128x32xbf16, #tpu.memory_space<vmem>>, vector<128x32xbf16>
    %c0_14 = arith.constant 0 : index
    %c0_15 = arith.constant 0 : index
    %18 = vector.load %arg7[%c0_14, %c0_15] : memref<1x32xf32, #tpu.memory_space<vmem>>, vector<1x32xf32>
    %cst_16 = arith.constant dense<0.000000e+00> : vector<8x32xf32>
    %19 = tpu.matmul %16, %17, %cst_16 {dimension_numbers = #tpu.dot_dimension_numbers<[1], [0], [0], [1], [0, 0, 1, 1], [], []>} : vector<8x128xbf16>, vector<128x32xbf16>, vector<8x32xf32> -> vector<8x32xf32>
    %20 = vector.broadcast %18 : vector<1x32xf32> to vector<8x32xf32>
    %21 = arith.addf %19, %20 : vector<8x32xf32>
    %c0_17 = arith.constant 0 : index
    %c0_18 = arith.constant 0 : index
    %22 = vector.load %arg8[%c0_17, %c0_18] : memref<8x32xf32, #tpu.memory_space<vmem>>, vector<8x32xf32>
    tpu.vector_store %arg8[%c0_17, %c0_18], %21 {strides = array<i32>} : memref<8x32xf32, #tpu.memory_space<vmem>>, vector<8x32xf32>,
    return
  }
  func.func @transform_0(%arg0: i32) -> (i32, i32) {
    %c0_i32 = arith.constant 0 : i32
    %c0_i32_0 = arith.constant 0 : i32
    return %arg0, %c0_i32 : i32, i32
  }
  func.func @transform_1(%arg0: i32) -> (i32, i32) {
    %c0_i32 = arith.constant 0 : i32
    %c0_i32_0 = arith.constant 0 : i32
    %c0_i32_1 = arith.constant 0 : i32
    return %c0_i32, %c0_i32_0 : i32, i32
  }
  func.func @transform_2(%arg0: i32) -> (i32, i32) {
    %c0_i32 = arith.constant 0 : i32
    %c0_i32_0 = arith.constant 0 : i32
    %c0_i32_1 = arith.constant 0 : i32
    return %c0_i32, %c0_i32_0 : i32, i32
  }
  func.func @transform_3(%arg0: i32) -> (i32, i32) {
    %c0_i32 = arith.constant 0 : i32
    %c0_i32_0 = arith.constant 0 : i32
    %c0_i32_1 = arith.constant 0 : i32
    return %c0_i32, %c0_i32_0 : i32, i32
  }
  func.func @transform_4(%arg0: i32) -> (i32, i32) {
    %c0_i32 = arith.constant 0 : i32
    %c0_i32_0 = arith.constant 0 : i32
    %c0_i32_1 = arith.constant 0 : i32
    return %c0_i32, %c0_i32_0 : i32, i32
  }
  func.func @transform_5(%arg0: i32) -> (i32, i32) {
    %c0_i32 = arith.constant 0 : i32
    %c0_i32_0 = arith.constant 0 : i32
    %c0_i32_1 = arith.constant 0 : i32
    return %c0_i32, %c0_i32_0 : i32, i32
  }
  func.func @transform_6(%arg0: i32) -> (i32, i32) {
    %c0_i32 = arith.constant 0 : i32
    %c0_i32_0 = arith.constant 0 : i32
    %c0_i32_1 = arith.constant 0 : i32
    return %c0_i32, %c0_i32_0 : i32, i32
  }
  func.func @transform_7(%arg0: i32) -> (i32, i32) {
    %c0_i32 = arith.constant 0 : i32
    %c0_i32_0 = arith.constant 0 : i32
    return %arg0, %c0_i32 : i32, i32
  }
}

</mosaic_0001>

<bundles_post_ra>
// kernel: tpu_custom_call.1
= control target key start
LH: loop header
LB: loop body
LE: loop exit
PB: predicated region body
PF: predicated region fallthrough
CT: control target
= control target key end

     0   :  { %v471_v1 = vmov 0.0   ;;  %vm472_vm0 = vmmov 0   ;;  %vm52_vm1 = vcmask 261120   ;;  %s609_s0 = inlined_call_operand.vmem [shape: bf16[8,32], index: 0, kind: input, shape index: {}]   ;;  %s610_s1 = inlined_call_operand.vmem [shape: bf16[32,128], index: 1, kind: input, shape index: {}]   ;;  %s611_s2 = inlined_call_operand.vmem [shape: f32[1,128], index: 2, kind: input, shape index: {}]   ;;  %s612_s3 = inlined_call_operand.vmem [shape: bf16[128,128], index: 3, kind: input, shape index: {}]   ;;  %s613_s4 = inlined_call_operand.vmem [shape: f32[1,128], index: 4, kind: input, shape index: {}]   ;;  %s614_s5 = inlined_call_operand.vmem [shape: bf16[128,32], index: 5, kind: input, shape index: {}]   ;;  %s615_s6 = inlined_call_operand.vmem [shape: f32[1,32], index: 6, kind: input, shape index: {}]   ;;  %s616_s7 = inlined_call_operand.hbm [shape: f32[8,32], index: 7, kind: output, shape index: {}]  }
   0x1   :  { %v431_v0 = vld [vmem:[%s610_s1 + $0x8] sm:$0xff]   ;;  %380 = vmatprep.subr.bf16.mxu0 %v471_v1  ;;  %388 = vmatprep.subr.bf16.mxu1 %v471_v1  ;;  %v432_v2 = vld [vmem:[%s610_s1] sm:$0xff]   ;;  %v433_v3 = vld [vmem:[%s612_s3 + $0x38] sm:$0xff]  }
   0x2   :  { %381 = vmatpush3.bf16.msra.mxu0 %v431_v0  ;;  %384 = vmatprep.mubr.msk.bf16.mxu0 %vm472_vm0, %v471_v1  ;;  %v434_v4 = vld [vmem:[%s612_s3 + $0x30] sm:$0xff]   ;;  %v28_v5 = vld [vmem:[%s609_s0] sm:$0xf]  ;;  %v435_v6 = vld [vmem:[%s612_s3 + $0x28] sm:$0xff]  }
   0x3   :  { %382 = vmatprep.subr.bf16.mxu0 %v471_v1  ;;  %404 = vmatprep.mubr.msk.bf16.mxu1 %vm472_vm0, %v471_v1  ;;  %v436_v7 = vld [vmem:[%s612_s3 + $0x20] sm:$0xff]  }
   0x4   :  { %389 = vmatpush3.bf16.msra.mxu1 %v433_v3 }
   0x5   :  { %390 = vmatprep.subr.bf16.mxu1 %v471_v1 }
   0x6   :  { %383 = vmatpush3.bf16.msra.mxu0 %v432_v2 }
   0x7   :  { %408 = vmatprep.subr.bf16.mxu0 %v471_v1 }
   0x8   :  { %391 = vmatpush3.bf16.msra.mxu1 %v434_v4 }
   0x9   :  { %385 = vmatmul.mubr.msk.bf16.vlgmr.msra.gmra.mxu0 %vm52_vm1, %v28_v5  ;;  %392 = vmatprep.subr.bf16.mxu1 %v471_v1 }
   0xa   :  { %424 = vmatprep.mubr.msk.bf16.mxu0 %vm472_vm0, %v471_v1 }
   0xc   :  { %393 = vmatpush3.bf16.msra.mxu1 %v435_v6 }
   0xd   :  { %394 = vmatprep.subr.bf16.mxu1 %v471_v1 }
   0xe   :  { %12 = vsyncpa [#allocation3], 0  ;;  %v437_v8 = vld [vmem:[%s612_s3 + $0x18] sm:$0xff]   ;;  %v438_v9 = vld [vmem:[%s612_s3 + $0x10] sm:$0xff]   ;;  %s473_s16 = smov [#allocation2]  }
   0xf   :  { %v439_v10 = vld [vmem:[%s612_s3 + $0x8] sm:$0xff]   ;;  %v440_v11 = vld [vmem:[%s612_s3] sm:$0xff]   ;;  %v441_v12 = vld [vmem:[%s614_s5 + $0x38] sm:$0xff]   ;;  %s329_s17 = sshll.u32 %s473_s16, 4  ;;  %s330_s17 = int_to_ptr.vmem [resolvable:$true] %s329_s17 }
  0x10   :  { %395 = vmatpush3.bf16.msra.mxu1 %v436_v7  ;;  %409 = vmatpush3.bf16.msra.mxu0 %v441_v12  ;;  %v442_v13 = vld [vmem:[%s614_s5 + $0x30] sm:$0xff]   ;;  %v443_v14 = vld [vmem:[%s614_s5 + $0x28] sm:$0xff]   ;;  %v444_v15 = vld [vmem:[%s614_s5 + $0x20] sm:$0xff]   ;;  %p454_p1 = scmp.lt.s32.totalorder %s330_s17, %s330_s17 }
  0x11   :  { %396 = vmatprep.subr.bf16.mxu1 %v471_v1  ;;  %410 = vmatprep.subr.bf16.mxu0 %v471_v1  ;;  %v445_v16 = vld [vmem:[%s614_s5 + $0x18] sm:$0xff]   ;;  %v446_v17 = vld [vmem:[%s614_s5 + $0x10] sm:$0xff]   ;;  %v337_v18 = vld [vmem:[%s611_s2] ss:$0 sm:$0xff] }
  0x12   :  { %v447_v26 = vld [vmem:[%s614_s5 + $0x8] sm:$0xff]   ;;  %v448_v27 = vld [vmem:[%s614_s5] sm:$0xff]  }
  0x13   :  { %v341_v28 = vld [vmem:[%s613_s4] ss:$0 sm:$0xff]  ;;  %s449_s4 = scalar_lea.vmem %s330_s17, 128 }
  0x14   :  { %397 = vmatpush3.bf16.msra.mxu1 %v437_v8  ;;  %411 = vmatpush3.bf16.msra.mxu0 %v442_v13  ;;  %v350_v36 = vld [vmem:[%s615_s6] ss:$0 sm:$0xff]  ;;  %p450_p0 = scmp.ne.s32.totalorder %s330_s17, %s449_s4  ;;  %p455_p2 = scmp.lt.s32.totalorder %s449_s4, %s449_s4 }
  0x15   :  { %398 = vmatprep.subr.bf16.mxu1 %v471_v1  ;;  %412 = vmatprep.subr.bf16.mxu0 %v471_v1 }
  0x16   :  { %p456_p3 = por %p455_p2, %p454_p1 }
  0x18   :  { %399 = vmatpush3.bf16.msra.mxu1 %v438_v9  ;;  %413 = vmatpush3.bf16.msra.mxu0 %v443_v14  ;;  %p457_p4 = pnand %p456_p3, %p450_p0 }
  0x19   :  { %400 = vmatprep.subr.bf16.mxu1 %v471_v1  ;;  %414 = vmatprep.subr.bf16.mxu0 %v471_v1 }
  0x1c   :  { %401 = vmatpush3.bf16.msra.mxu1 %v439_v10  ;;  %415 = vmatpush3.bf16.msra.mxu0 %v444_v15 }
  0x1d   :  { %402 = vmatprep.subr.bf16.mxu1 %v471_v1  ;;  %416 = vmatprep.subr.bf16.mxu0 %v471_v1 }
  0x20   :  { %403 = vmatpush3.bf16.msra.mxu1 %v440_v11  ;;  %417 = vmatpush3.bf16.msra.mxu0 %v445_v16 }
  0x21   :  { %418 = vmatprep.subr.bf16.mxu0 %v471_v1 }
  0x24   :  { %419 = vmatpush3.bf16.msra.mxu0 %v446_v17 }
  0x25   :  { %420 = vmatprep.subr.bf16.mxu0 %v471_v1 }
  0x28   :  { %421 = vmatpush3.bf16.msra.mxu0 %v447_v26 }
  0x29   :  { %422 = vmatprep.subr.bf16.mxu0 %v471_v1 }
  0x2c   :  { %423 = vmatpush3.bf16.msra.mxu0 %v448_v27 }
  0xc9   :  { %v90_v19 = vpop.f32.mrf.mxu0 }
  0xca   :  { %v91_v20 = vadd.f32 %v337_v18, %v90_v19 }
  0xcb   :  { %v386_v21 = vpop.f32.mrf.mxu0 }
  0xcc   :  { %v96_v22 = vmax.f32 %v91_v20, 0.0 }
  0xcd   :  { %v93_v23 = vpop.f32.mrf.mxu0 }
  0xce   :  { %v97_v24 = vpack.c.bf16 %v96_v22, %v96_v22 }
  0xcf   :  { %v387_v25 = vpop.f32.mrf.mxu0 }
  0xd0   :  { %405 = vmatmul.mubr.bf16.vlgmr.msra.gmra.mxu1 %v97_v24 }
 0x190   :  { %v203_v29 = vpop.f32.mrf.mxu1 }
 0x191   :  { %v204_v30 = vadd.f32 %v341_v28, %v203_v29 }
 0x192   :  { %v406_v31 = vpop.f32.mrf.mxu1 }
 0x193   :  { %v209_v32 = vmax.f32 %v204_v30, 0.0 }
 0x194   :  { %v206_v33 = vpop.f32.mrf.mxu1 }
 0x195   :  { %v210_v34 = vpack.c.bf16 %v209_v32, %v209_v32 }
 0x196   :  { %v407_v35 = vpop.f32.mrf.mxu1 }
 0x197   :  { %425 = vmatmul.mubr.bf16.vlgmr.msra.gmra.mxu0 %v210_v34 }
 0x257   :  { %v316_v37 = vpop.f32.mrf.mxu0 }
 0x258   :  { %v317_v38 = vadd.f32 %v350_v36, %v316_v37 }
 0x259   :  { %v426_v39 = vpop.f32.mrf.mxu0 }
 0x25a   :  { %322 = vst.msk [vmem:[#allocation2] sm:$0xff] %vm52_vm1, %v317_v38 }
 0x25b   :  { %v319_v40 = vpop.f32.mrf.mxu0 }
 0x25c   :  { %460 = shalt.err (!%p457_p4)
}
 0x25d   :  { %332 = dma.vmem_to_hbm [thread:$0]  %s330_s17, 128, %s616_s7, [#allocation3]   ;;  %v427_v41 = vpop.f32.mrf.mxu0 }
 0x25e   :  { %469 = dma.done.wait [#allocation3], 128  }
 0x25f   :  { %470 = vsyncadd [#allocation3], 4294967168 }
 0x260   :  { %336 = vsyncpa [#allocation3], 1 }

// kernel: tpu_custom_call.1
= control target key start
LH: loop header
LB: loop body
LE: loop exit
PB: predicated region body
PF: predicated region fallthrough
CT: control target
= control target key end

     0   :  { %v471_v1 = vmov 0.0   ;;  %vm472_vm0 = vmmov 0   ;;  %vm52_vm1 = vcmask 261120   ;;  %s609_s0 = inlined_call_operand.vmem [shape: bf16[8,32], index: 0, kind: input, shape index: {}]   ;;  %s610_s1 = inlined_call_operand.vmem [shape: bf16[32,128], index: 1, kind: input, shape index: {}]   ;;  %s611_s2 = inlined_call_operand.vmem [shape: f32[1,128], index: 2, kind: input, shape index: {}]   ;;  %s612_s3 = inlined_call_operand.vmem [shape: bf16[128,128], index: 3, kind: input, shape index: {}]   ;;  %s613_s4 = inlined_call_operand.vmem [shape: f32[1,128], index: 4, kind: input, shape index: {}]   ;;  %s614_s5 = inlined_call_operand.vmem [shape: bf16[128,32], index: 5, kind: input, shape index: {}]   ;;  %s615_s6 = inlined_call_operand.vmem [shape: f32[1,32], index: 6, kind: input, shape index: {}]   ;;  %s616_s7 = inlined_call_operand.hbm [shape: f32[8,32], index: 7, kind: output, shape index: {}]  }
   0x1   :  { %v431_v0 = vld [vmem:[%s610_s1 + $0x8] sm:$0xff]   ;;  %380 = vmatprep.subr.bf16.mxu0 %v471_v1  ;;  %388 = vmatprep.subr.bf16.mxu1 %v471_v1  ;;  %v432_v2 = vld [vmem:[%s610_s1] sm:$0xff]   ;;  %v433_v3 = vld [vmem:[%s612_s3 + $0x38] sm:$0xff]  }
   0x2   :  { %381 = vmatpush3.bf16.msra.mxu0 %v431_v0  ;;  %384 = vmatprep.mubr.msk.bf16.mxu0 %vm472_vm0, %v471_v1  ;;  %v434_v4 = vld [vmem:[%s612_s3 + $0x30] sm:$0xff]   ;;  %v28_v5 = vld [vmem:[%s609_s0] sm:$0xf]  ;;  %v435_v6 = vld [vmem:[%s612_s3 + $0x28] sm:$0xff]  }
   0x3   :  { %382 = vmatprep.subr.bf16.mxu0 %v471_v1  ;;  %404 = vmatprep.mubr.msk.bf16.mxu1 %vm472_vm0, %v471_v1  ;;  %v436_v7 = vld [vmem:[%s612_s3 + $0x20] sm:$0xff]  }
   0x4   :  { %389 = vmatpush3.bf16.msra.mxu1 %v433_v3 }
   0x5   :  { %390 = vmatprep.subr.bf16.mxu1 %v471_v1 }
   0x6   :  { %383 = vmatpush3.bf16.msra.mxu0 %v432_v2 }
   0x7   :  { %408 = vmatprep.subr.bf16.mxu0 %v471_v1 }
   0x8   :  { %391 = vmatpush3.bf16.msra.mxu1 %v434_v4 }
   0x9   :  { %385 = vmatmul.mubr.msk.bf16.vlgmr.msra.gmra.mxu0 %vm52_vm1, %v28_v5  ;;  %392 = vmatprep.subr.bf16.mxu1 %v471_v1 }
   0xa   :  { %424 = vmatprep.mubr.msk.bf16.mxu0 %vm472_vm0, %v471_v1 }
   0xc   :  { %393 = vmatpush3.bf16.msra.mxu1 %v435_v6 }
   0xd   :  { %394 = vmatprep.subr.bf16.mxu1 %v471_v1 }
   0xe   :  { %12 = vsyncpa [#allocation3], 0  ;;  %v437_v8 = vld [vmem:[%s612_s3 + $0x18] sm:$0xff]   ;;  %v438_v9 = vld [vmem:[%s612_s3 + $0x10] sm:$0xff]   ;;  %s473_s16 = smov [#allocation2]  }
   0xf   :  { %v439_v10 = vld [vmem:[%s612_s3 + $0x8] sm:$0xff]   ;;  %v440_v11 = vld [vmem:[%s612_s3] sm:$0xff]   ;;  %v441_v12 = vld [vmem:[%s614_s5 + $0x38] sm:$0xff]   ;;  %s329_s17 = sshll.u32 %s473_s16, 4  ;;  %s330_s17 = int_to_ptr.vmem [resolvable:$true] %s329_s17 }
  0x10   :  { %395 = vmatpush3.bf16.msra.mxu1 %v436_v7  ;;  %409 = vmatpush3.bf16.msra.mxu0 %v441_v12  ;;  %v442_v13 = vld [vmem:[%s614_s5 + $0x30] sm:$0xff]   ;;  %v443_v14 = vld [vmem:[%s614_s5 + $0x28] sm:$0xff]   ;;  %v444_v15 = vld [vmem:[%s614_s5 + $0x20] sm:$0xff]   ;;  %p454_p1 = scmp.lt.s32.totalorder %s330_s17, %s330_s17 }
  0x11   :  { %396 = vmatprep.subr.bf16.mxu1 %v471_v1  ;;  %410 = vmatprep.subr.bf16.mxu0 %v471_v1  ;;  %v445_v16 = vld [vmem:[%s614_s5 + $0x18] sm:$0xff]   ;;  %v446_v17 = vld [vmem:[%s614_s5 + $0x10] sm:$0xff]   ;;  %v337_v18 = vld [vmem:[%s611_s2] ss:$0 sm:$0xff] }
  0x12   :  { %v447_v26 = vld [vmem:[%s614_s5 + $0x8] sm:$0xff]   ;;  %v448_v27 = vld [vmem:[%s614_s5] sm:$0xff]  }
  0x13   :  { %v341_v28 = vld [vmem:[%s613_s4] ss:$0 sm:$0xff]  ;;  %s449_s4 = scalar_lea.vmem %s330_s17, 128 }
  0x14   :  { %397 = vmatpush3.bf16.msra.mxu1 %v437_v8  ;;  %411 = vmatpush3.bf16.msra.mxu0 %v442_v13  ;;  %v350_v36 = vld [vmem:[%s615_s6] ss:$0 sm:$0xff]  ;;  %p450_p0 = scmp.ne.s32.totalorder %s330_s17, %s449_s4  ;;  %p455_p2 = scmp.lt.s32.totalorder %s449_s4, %s449_s4 }
  0x15   :  { %398 = vmatprep.subr.bf16.mxu1 %v471_v1  ;;  %412 = vmatprep.subr.bf16.mxu0 %v471_v1 }
  0x16   :  { %p456_p3 = por %p455_p2, %p454_p1 }
  0x18   :  { %399 = vmatpush3.bf16.msra.mxu1 %v438_v9  ;;  %413 = vmatpush3.bf16.msra.mxu0 %v443_v14  ;;  %p457_p4 = pnand %p456_p3, %p450_p0 }
  0x19   :  { %400 = vmatprep.subr.bf16.mxu1 %v471_v1  ;;  %414 = vmatprep.subr.bf16.mxu0 %v471_v1 }
  0x1c   :  { %401 = vmatpush3.bf16.msra.mxu1 %v439_v10  ;;  %415 = vmatpush3.bf16.msra.mxu0 %v444_v15 }
  0x1d   :  { %402 = vmatprep.subr.bf16.mxu1 %v471_v1  ;;  %416 = vmatprep.subr.bf16.mxu0 %v471_v1 }
  0x20   :  { %403 = vmatpush3.bf16.msra.mxu1 %v440_v11  ;;  %417 = vmatpush3.bf16.msra.mxu0 %v445_v16 }
  0x21   :  { %418 = vmatprep.subr.bf16.mxu0 %v471_v1 }
  0x24   :  { %419 = vmatpush3.bf16.msra.mxu0 %v446_v17 }
  0x25   :  { %420 = vmatprep.subr.bf16.mxu0 %v471_v1 }
  0x28   :  { %421 = vmatpush3.bf16.msra.mxu0 %v447_v26 }
  0x29   :  { %422 = vmatprep.subr.bf16.mxu0 %v471_v1 }
  0x2c   :  { %423 = vmatpush3.bf16.msra.mxu0 %v448_v27 }
  0xc9   :  { %v90_v19 = vpop.f32.mrf.mxu0 }
  0xca   :  { %v91_v20 = vadd.f32 %v337_v18, %v90_v19 }
  0xcb   :  { %v386_v21 = vpop.f32.mrf.mxu0 }
  0xcc   :  { %v96_v22 = vmax.f32 %v91_v20, 0.0 }
  0xcd   :  { %v93_v23 = vpop.f32.mrf.mxu0 }
  0xce   :  { %v97_v24 = vpack.c.bf16 %v96_v22, %v96_v22 }
  0xcf   :  { %v387_v25 = vpop.f32.mrf.mxu0 }
  0xd0   :  { %405 = vmatmul.mubr.bf16.vlgmr.msra.gmra.mxu1 %v97_v24 }
 0x190   :  { %v203_v29 = vpop.f32.mrf.mxu1 }
 0x191   :  { %v204_v30 = vadd.f32 %v341_v28, %v203_v29 }
 0x192   :  { %v406_v31 = vpop.f32.mrf.mxu1 }
 0x193   :  { %v209_v32 = vmax.f32 %v204_v30, 0.0 }
 0x194   :  { %v206_v33 = vpop.f32.mrf.mxu1 }
 0x195   :  { %v210_v34 = vpack.c.bf16 %v209_v32, %v209_v32 }
 0x196   :  { %v407_v35 = vpop.f32.mrf.mxu1 }
 0x197   :  { %425 = vmatmul.mubr.bf16.vlgmr.msra.gmra.mxu0 %v210_v34 }
 0x257   :  { %v316_v37 = vpop.f32.mrf.mxu0 }
 0x258   :  { %v317_v38 = vadd.f32 %v350_v36, %v316_v37 }
 0x259   :  { %v426_v39 = vpop.f32.mrf.mxu0 }
 0x25a   :  { %322 = vst.msk [vmem:[#allocation2] sm:$0xff] %vm52_vm1, %v317_v38 }
 0x25b   :  { %v319_v40 = vpop.f32.mrf.mxu0 }
 0x25c   :  { %460 = shalt.err (!%p457_p4)
}
 0x25d   :  { %332 = dma.vmem_to_hbm [thread:$0]  %s330_s17, 128, %s616_s7, [#allocation3]   ;;  %v427_v41 = vpop.f32.mrf.mxu0 }
 0x25e   :  { %469 = dma.done.wait [#allocation3], 128  }
 0x25f   :  { %470 = vsyncadd [#allocation3], 4294967168 }
 0x260   :  { %336 = vsyncpa [#allocation3], 1 }

</bundles_post_ra>
